<compile_context>
chip_gen: v7x
topology: tpu7x:2x2x1
jax: 0.10.0
libtpu: 0.0.40
codegen_flags: <defaults>
</compile_context>

<pallas_src>
import functools

import jax
import jax.numpy as jnp
from jax.experimental import pallas as pl
from jax.experimental.pallas import tpu as pltpu


def _round_up(a, b):
    return (a + b - 1) // b * b


def _pick_token_tile():
    """Per-generation default expert token tile.

    Per expert step the arithmetic intensity vs. streamed weights is ~tile
    FLOPs/byte: v6e needs ~650+ (-> 1024), v7x ~310 but only 64 MiB VMEM
    (-> 512), v5e ~240 (-> 1024 is fine with 128 MiB VMEM).
    """
    try:
        vmem = pltpu.get_tpu_info().vmem_capacity_bytes
    except Exception:
        return 512
    return 512 if vmem <= (80 << 20) else 1024


# ---------------------------------------------------------------------------
# MoE gate (router)
# ---------------------------------------------------------------------------
def _moe_gate_kernel(x_ref, wt_ref, topk_w_ref, topk_idx_ref, *,
                     top_k: int, norm_topk_prob: bool):
    """One grid step: a tile of tokens vs. the full (resident) gating table.

    x_ref:        (TN, H)   token activations (native dtype, e.g. bf16)
    wt_ref:       (H, E)    gating weight, pre-transposed in prepare_moe_params
    topk_w_ref:   (TN, 128) lane-dense top-k routing weights (f32), cols >= K are 0
    topk_idx_ref: (TN, 128) lane-dense top-k expert indices (i32), cols >= K are 0
    """
    logits = jnp.dot(x_ref[...], wt_ref[...],
                     preferred_element_type=jnp.float32)            # (TN, E)

    tn, n_exp = logits.shape
    out_pad = topk_w_ref.shape[-1]

    lane_e = jax.lax.broadcasted_iota(jnp.int32, (tn, n_exp), 1)     # (TN, E)
    lane_o = jax.lax.broadcasted_iota(jnp.int32, (tn, out_pad), 1)   # (TN, 128)

    # Build the padded result slabs directly (no narrow concatenates / stores).
    sel_logits = jnp.full((tn, out_pad), -jnp.inf, jnp.float32)
    sel_idx = jnp.zeros((tn, out_pad), jnp.int32)

    cur = logits
    row_max = None                      # global max logit (== top-1 value)
    for k in range(top_k):              # top_k is a small static int -> unrolled
        cur_max = jnp.max(cur, axis=-1, keepdims=True)               # (TN, 1)
        if k == 0:
            row_max = cur_max
        # first index achieving the max (lowest expert id on exact ties)
        cur_idx = jnp.min(jnp.where(cur == cur_max, lane_e, n_exp),
                          axis=-1, keepdims=True)                    # (TN, 1)
        sel_logits = jnp.where(lane_o == k, cur_max, sel_logits)
        sel_idx = jnp.where(lane_o == k, cur_idx, sel_idx)
        if k + 1 < top_k:
            cur = jnp.where(lane_e == cur_idx, -jnp.inf, cur)

    if top_k > 1 and norm_topk_prob:
        # softmax restricted to the K winners == full softmax + renormalization.
        # (reference's +1e-20 eps is unnecessary: top-1 term is exactly 1 here)
        e_sel = jnp.exp(sel_logits - row_max)          # padded lanes: exp(-inf)=0
        topk_w = e_sel / jnp.sum(e_sel, axis=-1, keepdims=True)
    else:
        # full-softmax denominator, but only scale the K winners.
        z = jnp.sum(jnp.exp(logits - row_max), axis=-1, keepdims=True)
        topk_w = jnp.exp(sel_logits - row_max) / z

    topk_w_ref[...] = topk_w
    topk_idx_ref[...] = sel_idx


def moe_gate(x, gate_wt, *, top_k: int, norm_topk_prob: bool,
             token_tile: int = 256):
    """x: (N, H) flattened tokens; gate_wt: (H, E) pre-transposed.

    Returns (topk_idx [N,K] i32, topk_weight [N,K] f32, aux_loss=0.0).
    """
    n, h = x.shape
    n_exp = gate_wt.shape[1]

    tile = _round_up(min(token_tile, _round_up(n, 8)), 8)
    n_pad = _round_up(n, tile)
    if n_pad != n:
        x = jnp.pad(x, ((0, n_pad - n), (0, 0)))
    out_pad = _round_up(max(top_k, 1), 128)             # lane-dense outputs

    kernel = functools.partial(_moe_gate_kernel, top_k=top_k,
                               norm_topk_prob=norm_topk_prob)

    topk_w, topk_idx = pl.pallas_call(
        kernel,
        out_shape=(
            jax.ShapeDtypeStruct((n_pad, out_pad), jnp.float32),
            jax.ShapeDtypeStruct((n_pad, out_pad), jnp.int32),
        ),
        grid_spec=pltpu.PrefetchScalarGridSpec(
            num_scalar_prefetch=0,
            grid=(n_pad // tile,),
            in_specs=[
                pl.BlockSpec((tile, h), lambda i: (i, 0)),
                # Resident gating table (constant index_map).  For very large
                # E*H, single-buffering this spec would free VMEM for a larger
                # token tile.
                pl.BlockSpec((h, n_exp), lambda i: (0, 0)),
            ],
            out_specs=[
                pl.BlockSpec((tile, out_pad), lambda i: (i, 0)),
                pl.BlockSpec((tile, out_pad), lambda i: (i, 0)),
            ],
        ),
        compiler_params=pltpu.CompilerParams(
            dimension_semantics=("parallel",)),
    )(x, gate_wt)

    # eval mode -> aux_loss = 0
    # TODO(synk): training-time aux_loss (seq_aux / global) not implemented.
    return topk_idx[:n, :top_k], topk_w[:n, :top_k], jnp.float32(0.0)


# ---------------------------------------------------------------------------
# Sparse (grouped) expert dispatch
# ---------------------------------------------------------------------------
def _grouped_ffn_kernel(te_ref, active_ref, x_ref, w_ref,
                        w1t_ref, w3t_ref, w2t_ref, o_ref):
    """One token tile vs. the single expert that owns it.

    te_ref, active_ref: SMEM scalar-prefetch (per-tile expert id / active flag);
                        te_ref is consumed by the weight index_maps only.
    x_ref:  (T, D)   gathered, expert-sorted token activations
    w_ref:  (T, 1)   per-slot routing weights (0 for group-padding slots)
    w1t/w3t_ref: (D, HD); w2t_ref: (HD, D)   this tile's expert (squeezed dim)
    o_ref:  (T, D) f32   routing-weighted expert output for this tile
    """
    del te_ref
    i = pl.program_id(0)
    active = active_ref[i] != 0

    @pl.when(jnp.logical_not(active))
    def _():
        o_ref[...] = jnp.zeros_like(o_ref)

    @pl.when(active)
    def _():
        x = x_ref[...]
        h1 = jnp.dot(x, w1t_ref[...], preferred_element_type=jnp.float32)
        h3 = jnp.dot(x, w3t_ref[...], preferred_element_type=jnp.float32)
        # silu via EUP reciprocal (co-issues alongside the MXU/VPU work).
        sig = pl.reciprocal(1.0 + jnp.exp(-h1), approx=True)
        inter = (h1 * sig * h3).astype(x.dtype)
        y = jnp.dot(inter, w2t_ref[...], preferred_element_type=jnp.float32)
        o_ref[...] = (w_ref[...] * y).astype(o_ref.dtype)


def _build_dispatch(x, topk_idx, topk_w, n_routed, has_shared, tile):
    """Sort token/expert assignments by expert and pad groups to tile multiples.

    Returns gathered activations / weights / token ids in padded-sorted order,
    plus per-tile expert ids and active flags (scalar-prefetch inputs).
    """
    n, d = x.shape
    topk_idx = topk_idx.astype(jnp.int32)
    topk_w = topk_w.astype(jnp.float32)

    if has_shared:
        # Shared expert == expert index n_routed, weight 1 for every token.
        idx_aug = jnp.concatenate(
            [topk_idx, jnp.full((n, 1), n_routed, jnp.int32)], axis=1)
        w_aug = jnp.concatenate([topk_w, jnp.ones((n, 1), jnp.float32)], axis=1)
        n_exp = n_routed + 1
    else:
        idx_aug, w_aug, n_exp = topk_idx, topk_w, n_routed
    k_aug = idx_aug.shape[1]
    nk = n * k_aug

    flat_e = idx_aug.reshape(-1)                          # (NK,)
    flat_w = w_aug.reshape(-1)
    order = jnp.argsort(flat_e)
    sorted_e = flat_e[order]
    sorted_tok = (order // k_aug).astype(jnp.int32)
    sorted_w = flat_w[order]

    counts = jnp.bincount(flat_e, length=n_exp)           # (E_aug,)
    padded = ((counts + tile - 1) // tile) * tile
    g_start = (jnp.cumsum(counts) - counts).astype(jnp.int32)
    g_start_p = (jnp.cumsum(padded) - padded).astype(jnp.int32)
    pos = jnp.arange(nk, dtype=jnp.int32) - g_start[sorted_e]
    dest = g_start_p[sorted_e] + pos                      # unique slots

    cap = _round_up(nk + n_exp * (tile - 1), tile)        # static worst case
    num_tiles = cap // tile

    x_pad = jnp.zeros((cap, d), x.dtype).at[dest].set(x[sorted_tok])
    w_pad = jnp.zeros((cap, 1), jnp.float32).at[dest].set(sorted_w[:, None])
    tok_pad = jnp.full((cap,), n, jnp.int32).at[dest].set(sorted_tok)

    tiles_per_e = (padded // tile).astype(jnp.int32)
    tiles_cum = jnp.cumsum(tiles_per_e)
    t_idx = jnp.arange(num_tiles, dtype=jnp.int32)
    tile_expert = jnp.searchsorted(tiles_cum, t_idx, side="right")
    tile_expert = jnp.minimum(tile_expert, n_exp - 1).astype(jnp.int32)
    tile_active = (t_idx < tiles_cum[-1]).astype(jnp.int32)
    return x_pad, w_pad, tok_pad, tile_expert, tile_active, cap


def _vmem_limit_bytes(tile, d, hd, act_bytes, w_bytes):
    weights = 2 * 3 * d * hd * w_bytes                                 # dbl-buffered W1t/W3t/W2t
    streams = 2 * (tile * d * act_bytes + tile * 4 + tile * d * 4)     # x, w, out
    interm = 2 * tile * hd * 4 + tile * hd * act_bytes + tile * d * 4  # h1,h3,inter,y
    est = weights + streams + interm + (4 << 20)
    return int(min(64 << 20, max(32 << 20, est)))


def moe_experts_grouped(x, topk_idx, topk_w, params, *, token_tile=None):
    """x: (N, D); topk_idx/topk_w: (N, K); params from prepare_moe_params."""
    n, d = x.shape
    w1t, w3t, w2t = params["w1t"], params["w3t"], params["w2t"]
    n_routed, has_shared = params["n_routed"], params["has_shared"]
    _, _, hd = w1t.shape

    if token_tile is None:
        token_tile = _pick_token_tile()
    tile = max(8, min(_round_up(token_tile, 8), _round_up(n, 8)))

    x_pad, w_pad, tok_pad, tile_expert, tile_active, cap = _build_dispatch(
        x, topk_idx, topk_w, n_routed, has_shared, tile)
    num_tiles = cap // tile

    # TODO(synk): for very large D*HD on v7x (64 MiB VMEM), add an HD-chunk
    # grid axis so each weight block is (D, HD_tile) instead of (D, HD).
    y_pad = pl.pallas_call(
        _grouped_ffn_kernel,
        out_shape=jax.ShapeDtypeStruct((cap, d), jnp.float32),
        grid_spec=pltpu.PrefetchScalarGridSpec(
            num_scalar_prefetch=2,
            grid=(num_tiles,),
            in_specs=[
                pl.BlockSpec((tile, d), lambda i, te, ta: (i, 0)),
                pl.BlockSpec((tile, 1), lambda i, te, ta: (i, 0)),
                pl.BlockSpec((None, d, hd), lambda i, te, ta: (te[i], 0, 0)),
                pl.BlockSpec((None, d, hd), lambda i, te, ta: (te[i], 0, 0)),
                pl.BlockSpec((None, hd, d), lambda i, te, ta: (te[i], 0, 0)),
            ],
            out_specs=pl.BlockSpec((tile, d), lambda i, te, ta: (i, 0)),
        ),
        compiler_params=pltpu.CompilerParams(
            dimension_semantics=("arbitrary",),
            vmem_limit_bytes=_vmem_limit_bytes(
                tile, d, hd,
                jnp.dtype(x.dtype).itemsize, jnp.dtype(w1t.dtype).itemsize)),
    )(tile_expert, tile_active, x_pad, w_pad, w1t, w3t, w2t)

    # Scatter-add tile outputs back to token order; row n is the dump row for
    # padding slots (mirrors moe_infer's expert_cache.scatter_add_).
    y_tok = jnp.zeros((n + 1, d), jnp.float32).at[tok_pad].add(y_pad)
    return y_tok[:n]


# ---------------------------------------------------------------------------
# One-time parameter preparation (hoisted out of the forward)
# ---------------------------------------------------------------------------
def prepare_moe_params(gate_w, w1, w2, w3, shared_weights=None):
    """Pre-transpose weights for x @ W^T and fold the shared expert in as
    expert index E.  Call once; reuse the returned dict every forward."""
    w1t = jnp.transpose(w1, (0, 2, 1))   # (E, D, HD)
    w3t = jnp.transpose(w3, (0, 2, 1))   # (E, D, HD)
    w2t = jnp.transpose(w2, (0, 2, 1))   # (E, HD, D)
    has_shared = shared_weights is not None
    if has_shared:
        sw1, sw2, sw3 = shared_weights
        w1t = jnp.concatenate([w1t, sw1.T[None]], axis=0)
        w3t = jnp.concatenate([w3t, sw3.T[None]], axis=0)
        w2t = jnp.concatenate([w2t, sw2.T[None]], axis=0)
    return dict(gate_wt=gate_w.T, w1t=w1t, w3t=w3t, w2t=w2t,
                n_routed=int(w1.shape[0]), has_shared=has_shared)


# ---------------------------------------------------------------------------
# Full MOEFeedForward forward (eval path)
# ---------------------------------------------------------------------------
def moe_feed_forward(hidden_states, params, *, top_k: int,
                     norm_topk_prob: bool, gate_token_tile: int = 256,
                     expert_token_tile=None):
    bsz, seq_len, d = hidden_states.shape
    x = hidden_states.reshape(-1, d)

    topk_idx, topk_w, aux_loss = moe_gate(
        x, params["gate_wt"], top_k=top_k, norm_topk_prob=norm_topk_prob,
        token_tile=gate_token_tile)

    y = moe_experts_grouped(x, topk_idx, topk_w, params,
                            token_tile=expert_token_tile)
    y = y.astype(hidden_states.dtype).reshape(bsz, seq_len, d)
    return y, topk_idx, topk_w, aux_loss


# ---------------------------------------------------------------------------
# Pure-JAX reference mirroring the PyTorch forward (eval mode)
# ---------------------------------------------------------------------------
def _ffn_ref(x, w1, w2, w3):
    h1 = jnp.dot(x, w1.T, preferred_element_type=jnp.float32)
    h3 = jnp.dot(x, w3.T, preferred_element_type=jnp.float32)
    inter = (h1 / (1.0 + jnp.exp(-h1)) * h3).astype(x.dtype)
    return jnp.dot(inter, w2.T, preferred_element_type=jnp.float32)


def _reference(hidden_states, gate_w, w1, w2, w3, shared, *, top_k,
               norm_topk_prob):
    bsz, seq_len, d = hidden_states.shape
    x = hidden_states.reshape(-1, d)
    logits = jnp.dot(x, gate_w.T, preferred_element_type=jnp.float32)
    scores = jax.nn.softmax(logits, axis=-1)
    topk_w, topk_idx = jax.lax.top_k(scores, top_k)
    if top_k > 1 and norm_topk_prob:
        topk_w = topk_w / (jnp.sum(topk_w, axis=-1, keepdims=True) + 1e-20)
    y = jnp.zeros((x.shape[0], d), jnp.float32)
    for e in range(w1.shape[0]):
        w_e = jnp.sum(jnp.where(topk_idx == e, topk_w, 0.0), axis=-1,
                      keepdims=True)
        y = y + w_e * _ffn_ref(x, w1[e], w2[e], w3[e])
    if shared is not None:
        sw1, sw2, sw3 = shared
        y = y + _ffn_ref(x, sw1, sw2, sw3)
    return topk_idx.astype(jnp.int32), topk_w, y.reshape(bsz, seq_len, d)


if __name__ == "__main__":
    # Config consistent with the module: dim=32, multiple_of=16 -> hidden_dim=96,
    # n_routed_experts=8, num_experts_per_tok=2, norm_topk_prob=True,
    # n_shared_experts=1, dropout (eval) = identity.
    bsz, seq_len, dim = 2, 8, 32
    n_routed_experts, top_k = 8, 2
    norm_topk_prob = True
    multiple_of = 16
    hidden_dim = int(2 * (4 * dim) / 3)
    hidden_dim = multiple_of * ((hidden_dim + multiple_of - 1) // multiple_of)  # 96

    dtype = jnp.bfloat16
    keys = jax.random.split(jax.random.PRNGKey(0), 8)

    hidden_states = jax.random.normal(
        keys[0], (bsz, seq_len, dim), dtype=jnp.float32).astype(dtype)

    def init_linear(k, fan_out, fan_in):
        b = 1.0 / (fan_in ** 0.5)   # stand-in for kaiming_uniform_(a=sqrt(5))
        return jax.random.uniform(k, (fan_out, fan_in), minval=-b, maxval=b,
                                  dtype=jnp.float32).astype(dtype)

    gate_w = init_linear(keys[1], n_routed_experts, dim)
    w1 = jnp.stack([init_linear(k, hidden_dim, dim)
                    for k in jax.random.split(keys[2], n_routed_experts)])
    w2 = jnp.stack([init_linear(k, dim, hidden_dim)
                    for k in jax.random.split(keys[3], n_routed_experts)])
    w3 = jnp.stack([init_linear(k, hidden_dim, dim)
                    for k in jax.random.split(keys[4], n_routed_experts)])
    shared = (init_linear(keys[5], hidden_dim, dim),
              init_linear(keys[6], dim, hidden_dim),
              init_linear(keys[7], hidden_dim, dim))

    # One-time prep (hoisted transposes + shared-expert concat).
    params = prepare_moe_params(gate_w, w1, w2, w3, shared)

    # Tiny demo shapes -> small expert token tile so group padding stays small.
    y, topk_idx, topk_w, aux_loss = moe_feed_forward(
        hidden_states, params, top_k=top_k, norm_topk_prob=norm_topk_prob,
        gate_token_tile=256, expert_token_tile=8)
    jax.block_until_ready((y, topk_idx, topk_w, aux_loss))

    ref_idx, ref_w, ref_y = _reference(
        hidden_states, gate_w, w1, w2, w3, shared,
        top_k=top_k, norm_topk_prob=norm_topk_prob)

    assert jnp.all(topk_idx == ref_idx), "top-k indices mismatch"
    assert jnp.allclose(topk_w, ref_w, atol=1e-2, rtol=1e-2), \
        "top-k weights mismatch"
    assert jnp.allclose(y.astype(jnp.float32), ref_y.astype(jnp.float32),
                        atol=5e-2, rtol=5e-2), "MoE output mismatch"

    print("KERNEL_OK")
</pallas_src>

<mosaic_0001>
module attributes {stable_mosaic.version = 11 : i64} {
  func.func @_moe_gate_kernel(%arg0: i32, %arg1: memref<16x32xbf16, #tpu.memory_space<vmem>>, %arg2: memref<32x8xbf16, #tpu.memory_space<vmem>>, %arg3: memref<16x128xf32, #tpu.memory_space<vmem>>, %arg4: memref<16x128xi32, #tpu.memory_space<vmem>>) attributes {dimension_semantics = [#tpu.dimension_semantics<parallel>], iteration_bounds = array<i64: 1>, scalar_prefetch = 0 : i64, scratch_operands = 0 : i64, tpu.core_type = #tpu.core_type<tc>, window_params = [{transform_indices = @transform_0, window_bounds = array<i64: 16, 32>}, {pipeline_mode = #tpu.pipeline_mode<synchronous>, transform_indices = @transform_1, window_bounds = array<i64: 32, 8>}, {transform_indices = @transform_2, window_bounds = array<i64: 16, 128>}, {transform_indices = @transform_3, window_bounds = array<i64: 16, 128>}]} {
    %c0 = arith.constant 0 : index
    %c0_0 = arith.constant 0 : index
    %0 = vector.load %arg1[%c0, %c0_0] : memref<16x32xbf16, #tpu.memory_space<vmem>>, vector<16x32xbf16>
    %c0_1 = arith.constant 0 : index
    %c0_2 = arith.constant 0 : index
    %1 = vector.load %arg2[%c0_1, %c0_2] : memref<32x8xbf16, #tpu.memory_space<vmem>>, vector<32x8xbf16>
    %cst = arith.constant dense<0.000000e+00> : vector<16x8xf32>
    %2 = tpu.matmul %0, %1, %cst {dimension_numbers = #tpu.dot_dimension_numbers<[1], [0], [0], [1], [0, 0, 1, 1], [], []>} : vector<16x32xbf16>, vector<32x8xbf16>, vector<16x8xf32> -> vector<16x8xf32>
    %3 = tpu.iota {dimensions = array<i32: 1>} : vector<16x8xi32>
    %4 = tpu.iota {dimensions = array<i32: 1>} : vector<16x128xi32>
    %cst_3 = arith.constant 0xFF800000 : f32
    %5 = vector.broadcast %cst_3 : f32 to vector<16x128xf32>
    %c0_i32 = arith.constant 0 : i32
    %6 = vector.broadcast %c0_i32 : i32 to vector<16x128xi32>
    %cst_4 = arith.constant dense<0xFF800000> : vector<16xf32>
    %7 = vector.multi_reduction <maximumf>, %2, %cst_4 [1] : vector<16x8xf32> to vector<16xf32>
    %8 = vector.shape_cast %7 : vector<16xf32> to vector<16x1xf32>
    %9 = vector.broadcast %8 : vector<16x1xf32> to vector<16x8xf32>
    %10 = arith.cmpf oeq, %2, %9 : vector<16x8xf32>
    %c8_i32 = arith.constant 8 : i32
    %11 = vector.broadcast %c8_i32 : i32 to vector<16x8xi32>
    %12 = arith.select %10, %3, %11 : vector<16x8xi1>, vector<16x8xi32>
    %cst_5 = arith.constant dense<2147483647> : vector<16xi32>
    %13 = vector.multi_reduction <minsi>, %12, %cst_5 [1] : vector<16x8xi32> to vector<16xi32>
    %14 = vector.shape_cast %13 : vector<16xi32> to vector<16x1xi32>
    %c0_i32_6 = arith.constant 0 : i32
    %15 = vector.broadcast %c0_i32_6 : i32 to vector<16x128xi32>
    %16 = arith.cmpi eq, %4, %15 : vector<16x128xi32>
    %17 = vector.shape_cast %8 : vector<16x1xf32> to vector<16x1xf32>
    %18 = vector.broadcast %17 : vector<16x1xf32> to vector<16x128xf32>
    %19 = arith.select %16, %18, %5 : vector<16x128xi1>, vector<16x128xf32>
    %c0_i32_7 = arith.constant 0 : i32
    %20 = vector.broadcast %c0_i32_7 : i32 to vector<16x128xi32>
    %21 = arith.cmpi eq, %4, %20 : vector<16x128xi32>
    %22 = vector.shape_cast %14 : vector<16x1xi32> to vector<16x1xi32>
    %23 = vector.broadcast %22 : vector<16x1xi32> to vector<16x128xi32>
    %24 = arith.select %21, %23, %6 : vector<16x128xi1>, vector<16x128xi32>
    %25 = vector.broadcast %14 : vector<16x1xi32> to vector<16x8xi32>
    %26 = arith.cmpi eq, %3, %25 : vector<16x8xi32>
    %cst_8 = arith.constant 0xFF800000 : f32
    %27 = vector.broadcast %cst_8 : f32 to vector<16x8xf32>
    %28 = arith.select %26, %27, %2 : vector<16x8xi1>, vector<16x8xf32>
    %cst_9 = arith.constant dense<0xFF800000> : vector<16xf32>
    %29 = vector.multi_reduction <maximumf>, %28, %cst_9 [1] : vector<16x8xf32> to vector<16xf32>
    %30 = vector.shape_cast %29 : vector<16xf32> to vector<16x1xf32>
    %31 = vector.broadcast %30 : vector<16x1xf32> to vector<16x8xf32>
    %32 = arith.cmpf oeq, %28, %31 : vector<16x8xf32>
    %c8_i32_10 = arith.constant 8 : i32
    %33 = vector.broadcast %c8_i32_10 : i32 to vector<16x8xi32>
    %34 = arith.select %32, %3, %33 : vector<16x8xi1>, vector<16x8xi32>
    %cst_11 = arith.constant dense<2147483647> : vector<16xi32>
    %35 = vector.multi_reduction <minsi>, %34, %cst_11 [1] : vector<16x8xi32> to vector<16xi32>
    %36 = vector.shape_cast %35 : vector<16xi32> to vector<16x1xi32>
    %c1_i32 = arith.constant 1 : i32
    %37 = vector.broadcast %c1_i32 : i32 to vector<16x128xi32>
    %38 = arith.cmpi eq, %4, %37 : vector<16x128xi32>
    %39 = vector.shape_cast %30 : vector<16x1xf32> to vector<16x1xf32>
    %40 = vector.broadcast %39 : vector<16x1xf32> to vector<16x128xf32>
    %41 = arith.select %38, %40, %19 : vector<16x128xi1>, vector<16x128xf32>
    %c1_i32_12 = arith.constant 1 : i32
    %42 = vector.broadcast %c1_i32_12 : i32 to vector<16x128xi32>
    %43 = arith.cmpi eq, %4, %42 : vector<16x128xi32>
    %44 = vector.shape_cast %36 : vector<16x1xi32> to vector<16x1xi32>
    %45 = vector.broadcast %44 : vector<16x1xi32> to vector<16x128xi32>
    %46 = arith.select %43, %45, %24 : vector<16x128xi1>, vector<16x128xi32>
    %47 = vector.broadcast %8 : vector<16x1xf32> to vector<16x128xf32>
    %48 = arith.subf %41, %47 : vector<16x128xf32>
    %49 = math.exp %48 : vector<16x128xf32>
    %cst_13 = arith.constant dense<0.000000e+00> : vector<16xf32>
    %50 = vector.multi_reduction <add>, %49, %cst_13 [1] : vector<16x128xf32> to vector<16xf32>
    %51 = vector.shape_cast %50 : vector<16xf32> to vector<16x1xf32>
    %52 = vector.broadcast %51 : vector<16x1xf32> to vector<16x128xf32>
    %53 = arith.divf %49, %52 : vector<16x128xf32>
    %c0_14 = arith.constant 0 : index
    %c0_15 = arith.constant 0 : index
    %54 = vector.load %arg3[%c0_14, %c0_15] : memref<16x128xf32, #tpu.memory_space<vmem>>, vector<16x128xf32>
    tpu.vector_store %arg3[%c0_14, %c0_15], %53 {strides = array<i32>} : memref<16x128xf32, #tpu.memory_space<vmem>>, vector<16x128xf32>,
    %c0_16 = arith.constant 0 : index
    %c0_17 = arith.constant 0 : index
    %55 = vector.load %arg4[%c0_16, %c0_17] : memref<16x128xi32, #tpu.memory_space<vmem>>, vector<16x128xi32>
    tpu.vector_store %arg4[%c0_16, %c0_17], %46 {strides = array<i32>} : memref<16x128xi32, #tpu.memory_space<vmem>>, vector<16x128xi32>,
    return
  }
  func.func @transform_0(%arg0: i32) -> (i32, i32) {
    %c0_i32 = arith.constant 0 : i32
    %c0_i32_0 = arith.constant 0 : i32
    return %arg0, %c0_i32 : i32, i32
  }
  func.func @transform_1(%arg0: i32) -> (i32, i32) {
    %c0_i32 = arith.constant 0 : i32
    %c0_i32_0 = arith.constant 0 : i32
    %c0_i32_1 = arith.constant 0 : i32
    return %c0_i32, %c0_i32_0 : i32, i32
  }
  func.func @transform_2(%arg0: i32) -> (i32, i32) {
    %c0_i32 = arith.constant 0 : i32
    %c0_i32_0 = arith.constant 0 : i32
    return %arg0, %c0_i32 : i32, i32
  }
  func.func @transform_3(%arg0: i32) -> (i32, i32) {
    %c0_i32 = arith.constant 0 : i32
    %c0_i32_0 = arith.constant 0 : i32
    return %arg0, %c0_i32 : i32, i32
  }
}

</mosaic_0001>

<bundles_post_ra>
// kernel: tpu_custom_call.1
= control target key start
LH: loop header
LB: loop body
LE: loop exit
PB: predicated region body
PF: predicated region fallthrough
CT: control target
= control target key end

     0   :  { %9 = vsyncpa [#allocation3], 0  ;;  %v311_v1 = vmov 0.0   ;;  %vm312_vm0 = vmmov 0   ;;  %s418_s0 = inlined_call_operand.vmem [shape: bf16[16,32], index: 0, kind: input, shape index: {}]   ;;  %s419_s1 = inlined_call_operand.vmem [shape: bf16[32,8], index: 1, kind: input, shape index: {}]   ;;  %s420_s2 = inlined_call_operand.hbm [shape: f32[16,128], index: 2, kind: output, shape index: {0}]   ;;  %s421_s3 = inlined_call_operand.hbm [shape: s32[16,128], index: 3, kind: output, shape index: {1}]  }
   0x1   :  { %v252_v0 = vld [vmem:[%s419_s1] sm:$0xff]   ;;  %238 = vmatprep.subr.bf16.mxu0 %v311_v1  ;;  %v253_v2 = vld [vmem:[%s419_s1 + $0x8] sm:$0xff]   ;;  %242 = vmatprep.mubr.msk.bf16.mxu0 %vm312_vm0, %v311_v1 }
   0x2   :  { %239 = vmatpush3.bf16.msra.mxu0 %v252_v0 }
   0x3   :  { %240 = vmatprep.subr.bf16.mxu0 %v311_v1 }
   0x4   :  { %10 = vsyncpa [#allocation5], 0  ;;  %v254_v3 = vld [vmem:[%s418_s0] sm:$0xff]   ;;  %vm39_vm1 = vcmask 261120   ;;  %vm86_vm2 = vcmask 64512   ;;  %v84_v10 = vlaneseq  ;;  %s313_s0 = smov [#allocation2]  }
   0x5   :  { %s204_s1 = sshll.u32 %s313_s0, 4  ;;  %s205_s1 = int_to_ptr.vmem [resolvable:$true] %s204_s1 }
   0x6   :  { %241 = vmatpush3.bf16.msra.mxu0 %v253_v2  ;;  %v348_v11 = vand.u32 127, %v84_v10  ;;  %s263_s18 = scalar_lea.vmem %s205_s1, 256  ;;  %p268_p1 = scmp.lt.s32.totalorder %s205_s1, %s205_s1 }
   0x7   :  { %p264_p0 = scmp.ne.s32.totalorder %s205_s1, %s263_s18  ;;  %p269_p2 = scmp.lt.s32.totalorder %s263_s18, %s263_s18 }
   0x8   :  { %vm127_vm9 = vcmp.eq.s32.totalorder %v348_v11, 0  ;;  %vm176_vm10 = vcmp.eq.s32.totalorder %v348_v11, 1 }
   0x9   :  { %243 = vmatmul.mubr.msk.bf16.vlgmr.msra.gmra.mrb[0].mxu0 %vm39_vm1, %v254_v3  ;;  %p270_p3 = por %p269_p2, %p268_p1 }
   0xb   :  { %p271_p4 = pnand %p270_p3, %p264_p0 }
  0xdc   :  { %v77_v4 = vpop.f32.mrb[0].mxu0 }
  0xdd   :  { %v244_v5 = vpop.f32.mrb[1].mxu0  ;;  %v87_v6 = vsel %vm86_vm2, %v77_v4, -inf }
  0xde   :  { %88 = vmax.xlane.f32.xlu0 %v87_v6  ;;  %v80_v7 = vpop.f32.mrb[2].mxu0 }
  0xdf   :  { %v245_v8 = vpop.f32.mrb[3].mxu0  ;;  %v90_v9 = vsel %vm86_vm2, %v80_v7, -inf }
  0xe2   :  { %91 = vmax.xlane.f32.xlu0 %v90_v9 }
 0x16b   :  { %v89_v12 = vpop.xlane.xlu0 %88 }
 0x16c   :  { %vm93_vm3 = vcmp.eq.f32.partialorder %v77_v4, %v89_v12  ;;  %v128_v44 = vsel %vm127_vm9, %v89_v12, -inf }
 0x16d   :  { %v95_v13 = vsel %vm93_vm3, %v348_v11, 8 }
 0x16e   :  { %v97_v14 = vsel %vm86_vm2, %v95_v13, 2147483647 }
 0x16f   :  { %v92_v15 = vpop.xlane.xlu0 %91  ;;  %v99_v16 = vshra.s32 %v97_v14, 16  ;;  %v98_v22 = vand.u32 65535, %v97_v14 }
 0x170   :  { %vm94_vm4 = vcmp.eq.f32.partialorder %v80_v7, %v92_v15  ;;  %v129_v50 = vsel %vm127_vm9, %v92_v15, -inf }
 0x171   :  { %v101_v17 = vcvt.s32.f32 %v99_v16  ;;  %v96_v18 = vsel %vm94_vm4, %v348_v11, 8  ;;  %v100_v24 = vcvt.s32.f32 %v98_v22 }
 0x172   :  { %v112_v19 = vsel %vm86_vm2, %v96_v18, 2147483647 }
 0x173   :  { %102 = vmin.xlane.f32.xlu1 %v101_v17  ;;  %v114_v20 = vshra.s32 %v112_v19, 16  ;;  %v113_v25 = vand.u32 65535, %v112_v19 }
 0x175   :  { %v116_v21 = vcvt.s32.f32 %v114_v20  ;;  %v115_v28 = vcvt.s32.f32 %v113_v25 }
 0x177   :  { %117 = vmin.xlane.f32.xlu1 %v116_v21 }
 0x200   :  { %v103_v23 = vpop.xlane.xlu1 %102 }
 0x201   :  { %vm104_vm5 = vcmp.eq.f32.partialorder %v101_v17, %v103_v23  ;;  %v109_v30 = vcvt.f32.s32 %v103_v23 }
 0x202   :  { %v105_v26 = vsel %vm104_vm5, %v100_v24, inf }
 0x203   :  { %106 = vmin.xlane.f32.xlu0 %v105_v26  ;;  %v110_v32 = vshll.u32 %v109_v30, 16 }
 0x204   :  { %v118_v27 = vpop.xlane.xlu1 %117 }
 0x205   :  { %vm119_vm6 = vcmp.eq.f32.partialorder %v116_v21, %v118_v27  ;;  %v124_v33 = vcvt.f32.s32 %v118_v27 }
 0x206   :  { %v120_v29 = vsel %vm119_vm6, %v115_v28, inf }
 0x207   :  { %121 = vmin.xlane.f32.xlu1 %v120_v29  ;;  %v125_v37 = vshll.u32 %v124_v33, 16 }
 0x290   :  { %v107_v31 = vpop.xlane.xlu0 %106 }
 0x291   :  { %v108_v34 = vcvt.f32.s32 %v107_v31 }
 0x293   :  { %v354_v35 = vadd.s32 %v110_v32, %v108_v34 }
 0x294   :  { %v122_v36 = vpop.xlane.xlu1 %121 }
 0x295   :  { %v123_v38 = vcvt.f32.s32 %v122_v36  ;;  %vm132_vm7 = vcmp.eq.s32.totalorder %v348_v11, %v354_v35 }
 0x296   :  { %v134_v39 = vsel %vm132_vm7, -inf, %v77_v4 }
 0x297   :  { %v358_v40 = vadd.s32 %v125_v37, %v123_v38  ;;  %v136_v41 = vsel %vm86_vm2, %v134_v39, -inf }
 0x298   :  { %137 = vmax.xlane.f32.xlu0 %v136_v41 }
 0x299   :  { %vm133_vm8 = vcmp.eq.s32.totalorder %v348_v11, %v358_v40 }
 0x29a   :  { %v135_v42 = vsel %vm133_vm8, -inf, %v80_v7 }
 0x29b   :  { %v139_v43 = vsel %vm86_vm2, %v135_v42, -inf }
 0x29c   :  { %140 = vmax.xlane.f32.xlu1 %v139_v43 }
 0x325   :  { %v138_v45 = vpop.xlane.xlu0 %137 }
 0x326   :  { %vm142_vm11 = vcmp.eq.f32.partialorder %v134_v39, %v138_v45  ;;  %v177_v46 = vsel %vm176_vm10, %v138_v45, %v128_v44 }
 0x327   :  { %v144_v47 = vsel %vm142_vm11, %v348_v11, 8  ;;  %v181_v48 = vsub.f32 %v177_v46, %v89_v12 }
 0x328   :  { %v146_v49 = vsel %vm86_vm2, %v144_v47, 2147483647 }
 0x329   :  { %v183_v51 = vmul.f32 1.442695, %v181_v48  ;;  %v141_v52 = vpop.xlane.xlu1 %140  ;;  %v148_v53 = vshra.s32 %v146_v49, 16  ;;  %v147_v0 = vand.u32 65535, %v146_v49 }
 0x32a   :  { %vm143_vm12 = vcmp.eq.f32.partialorder %v135_v42, %v141_v52  ;;  %v178_v54 = vsel %vm176_vm10, %v141_v52, %v129_v50 }
 0x32b   :  { %255 = vpow2.f32 %v183_v51  ;;  %v145_v55 = vsel %vm143_vm12, %v348_v11, 8  ;;  %v182_v56 = vsub.f32 %v178_v54, %v92_v15  ;;  %v150_v57 = vcvt.s32.f32 %v148_v53 }
 0x32c   :  { %v161_v58 = vsel %vm86_vm2, %v145_v55, 2147483647  ;;  %v149_v2 = vcvt.s32.f32 %v147_v0 }
 0x32d   :  { %v185_v59 = vmul.f32 1.442695, %v182_v56  ;;  %151 = vmin.xlane.f32.xlu0 %v150_v57  ;;  %v163_v60 = vshra.s32 %v161_v58, 16  ;;  %v162_v3 = vand.u32 65535, %v161_v58 }
 0x32f   :  { %257 = vpow2.f32 %v185_v59  ;;  %v165_v61 = vcvt.s32.f32 %v163_v60  ;;  %v164_v6 = vcvt.s32.f32 %v162_v3 }
 0x331   :  { %166 = vmin.xlane.f32.xlu1 %v165_v61 }
 0x335   :  { %v256_v62 = vpop.eup %255 }
 0x336   :  { %187 = vadd.xlane.f32.xlu0 %v256_v62 }
 0x339   :  { %v258_v63 = vpop.eup %257 }
 0x33a   :  { %189 = vadd.xlane.f32.xlu1 %v258_v63 }
 0x3ba   :  { %v152_v1 = vpop.xlane.xlu0 %151 }
 0x3bb   :  { %vm153_vm13 = vcmp.eq.f32.partialorder %v150_v57, %v152_v1 }
 0x3bc   :  { %v154_v4 = vsel %vm153_vm13, %v149_v2, inf }
 0x3bd   :  { %155 = vmin.xlane.f32.xlu0 %v154_v4 }
 0x3be   :  { %v167_v5 = vpop.xlane.xlu1 %166 }
 0x3bf   :  { %vm168_vm14 = vcmp.eq.f32.partialorder %v165_v61, %v167_v5 }
 0x3c0   :  { %v169_v7 = vsel %vm168_vm14, %v164_v6, inf }
 0x3c1   :  { %170 = vmin.xlane.f32.xlu1 %v169_v7 }
 0x3c3   :  { %v188_v8 = vpop.xlane.xlu0 %187 }
 0x3c4   :  { %259 = vrcp.f32 %v188_v8 }
 0x3c7   :  { %v190_v9 = vpop.xlane.xlu1 %189 }
 0x3c8   :  { %261 = vrcp.f32 %v190_v9 }
 0x3ce   :  { %v260_v10 = vpop.eup %259 }
 0x3cf   :  { %v192_v12 = vmul.f32 %v260_v10, %v256_v62 }
 0x3d1   :  { %195 = vst [vmem:[#allocation2] sm:$0xff] %v192_v12 }
 0x3d2   :  { %v262_v13 = vpop.eup %261 }
 0x3d3   :  { %v194_v14 = vmul.f32 %v262_v13, %v258_v63 }
 0x3d5   :  { %196 = vst [vmem:[#allocation2 + $0x8] sm:$0xff] %v194_v14 }
 0x3d6   :  { %274 = shalt.err (!%p271_p4)
}
 0x3d7   :  { %s275_s21 = scalar_lea.hbm %s420_s2, 256 }
 0x3d8   :  { %p276_p5 = scmp.ne.s32.totalorder %s420_s2, %s275_s21  ;;  %p279_p6 = scmp.lt.u32.totalorder %s275_s21, %s420_s2 }
 0x3da   :  { %p281_p7 = pnand %p279_p6, %p276_p5 }
 0x3dc   :  { %284 = shalt.err (!%p281_p7)
}
 0x3dd   :  { %s314_s26 = smov 128   ;;  %s315_s27 = smov 8   ;;  %v158_v15 = vcvt.f32.s32 %v152_v1  ;;  %v173_v18 = vcvt.f32.s32 %v167_v5  ;;  %v130_v21 = vsel %vm127_vm9, %v354_v35, 0  ;;  %v131_v27 = vsel %vm127_vm9, %v358_v40, 0 }
 0x3de   :  { %210 = dma.vmem_to_hbm [thread:$0]  %s205_s1, 256, %s420_s2, [#allocation3], %s314_s26, %s314_s26, %s315_s27  }
 0x3df   :  { %v159_v17 = vshll.u32 %v158_v15, 16  ;;  %v174_v23 = vshll.u32 %v173_v18, 16  ;;  %s316_s30 = smov [#allocation4]  }
 0x3e0   :  { %s216_s4 = sshll.u32 %s316_s30, 4  ;;  %s217_s4 = int_to_ptr.vmem [resolvable:$true] %s216_s4 }
 0x3e1   :  { %s285_s2 = scalar_lea.vmem %s217_s4, 256  ;;  %p290_p9 = scmp.lt.s32.totalorder %s217_s4, %s217_s4 }
 0x3e2   :  { %p286_p8 = scmp.ne.s32.totalorder %s217_s4, %s285_s2  ;;  %p291_p10 = scmp.lt.s32.totalorder %s285_s2, %s285_s2 }
 0x3e4   :  { %p292_p11 = por %p291_p10, %p290_p9 }
 0x3e6   :  { %p293_p12 = pnand %p292_p11, %p286_p8 }
 0x44a   :  { %v156_v16 = vpop.xlane.xlu0 %155 }
 0x44b   :  { %v157_v19 = vcvt.f32.s32 %v156_v16 }
 0x44d   :  { %v160_v20 = vadd.s32 %v159_v17, %v157_v19 }
 0x44e   :  { %v171_v22 = vpop.xlane.xlu1 %170 }
 0x44f   :  { %v179_v24 = vsel %vm176_vm10, %v160_v20, %v130_v21  ;;  %v172_v25 = vcvt.f32.s32 %v171_v22 }
 0x450   :  { %197 = vst [vmem:[#allocation4] sm:$0xff] %v179_v24 }
 0x451   :  { %v175_v26 = vadd.s32 %v174_v23, %v172_v25 }
 0x453   :  { %v180_v28 = vsel %vm176_vm10, %v175_v26, %v131_v27 }
 0x454   :  { %198 = vst [vmem:[#allocation4 + $0x8] sm:$0xff] %v180_v28 }
 0x455   :  { %296 = shalt.err (!%p293_p12)
}
 0x456   :  { %s297_s7 = scalar_lea.hbm %s421_s3, 256 }
 0x457   :  { %p298_p13 = scmp.ne.s32.totalorder %s421_s3, %s297_s7  ;;  %p301_p0 = scmp.lt.u32.totalorder %s297_s7, %s421_s3 }
 0x459   :  { %p303_p1 = pnand %p301_p0, %p298_p13 }
 0x45b   :  { %306 = shalt.err (!%p303_p1)
}
 0x45c   :  { %222 = dma.vmem_to_hbm [thread:$0]  %s217_s4, 256, %s421_s3, [#allocation5], %s314_s26, %s314_s26, %s315_s27  }
 0x45d   :  { %307 = dma.done.wait [#allocation3], 256  }
 0x45e   :  { %308 = vsyncadd [#allocation3], 4294967040 }
 0x45f   :  { %309 = dma.done.wait [#allocation5], 256  }
 0x460   :  { %310 = vsyncadd [#allocation5], 4294967040 }
 0x461   :  { %229 = vsyncpa [#allocation3], 1 }
 0x462   :  { %230 = vsyncpa [#allocation5], 1 }

</bundles_post_ra>
